<compile_context>
chip_gen: v7x
topology: tpu7x:2x2x1
jax: 0.10.0
libtpu: 0.0.40
codegen_flags: <defaults>
</compile_context>

<pallas_src>
import functools

import jax
import jax.numpy as jnp
from jax import lax
from jax.experimental import pallas as pl
from jax.experimental.pallas import tpu as pltpu


def _round_up(n, m):
    return ((n + m - 1) // m) * m


def _choose_bt(B, n_out, FP, K9):
    """Samples per grid step: fit ~16 MiB per step, keep >=2 grid steps for v7x megacore."""
    per_sample = n_out * FP * 4 + 2 * n_out * K9 * 2   # f32 activation + 2x bf16 im2col block
    budget = 16 * 1024 * 1024
    bt = max(1, budget // max(per_sample, 1))
    bt = min(bt, 32)                                   # diminishing returns past ~32
    if B >= 2:
        bt = min(bt, (B + 1) // 2)                     # keep >= 2 grid steps
    return max(1, min(bt, B))


# ----------------------------------------------------------------------------
# Fused kernel: (im2col GEMM conv) + bias + ReLU + global-avg-pool + Linear
# one grid step == Bt batch elements, stacked along M
# ----------------------------------------------------------------------------
def _simplenet_kernel(xcol_ref, w_ref, bconv_ref, wc_ref, bcls_ref, y_ref, f_ref,
                      *, n_out, inv_hw):
    # xcol_ref: (Bt, n_out, K9)  bf16   wrapper-side im2col patches
    # w_ref:    (K9, FP)         bf16   conv taps, K index = (dy*3+dx)*C + c
    # bconv_ref:(1, FP)          f32
    # wc_ref:   (FP, NCP)        bf16   classifier weight (padded rows/cols are zero)
    # bcls_ref: (1, NCP)         f32
    # y_ref:    (1, Bt, NCP)     f32
    # f_ref:    (1, Bt, FP)      f32
    Bt = xcol_ref.shape[0]
    K9 = xcol_ref.shape[2]
    FP = w_ref.shape[1]

    # Single K=9C GEMM with all Bt samples stacked along M; f32 accumulation on the MXU.
    xm = xcol_ref[...].reshape(Bt * n_out, K9)                       # layout-preserving merge
    acc = jnp.dot(xm, w_ref[...], preferred_element_type=jnp.float32)  # [Bt*n_out, FP] f32
    act = jnp.maximum(acc + bconv_ref[...], 0.0)

    # Global average pool on VPU/XLU (f32), one row per sample.
    if Bt == 1:
        pooled = jnp.sum(act, axis=0, keepdims=True) * inv_hw        # [1, FP]
    else:
        pooled = jnp.sum(act.reshape(Bt, n_out, FP), axis=1) * inv_hw  # [Bt, FP]

    f_ref[0] = pooled
    y_ref[0] = (jnp.dot(pooled.astype(jnp.bfloat16), wc_ref[...],
                        preferred_element_type=jnp.float32) + bcls_ref[...])


# ----------------------------------------------------------------------------
# Wrapper: layout prep (cheap XLA glue) + pallas_call
# ----------------------------------------------------------------------------
@functools.partial(jax.jit, static_argnames=("return_feature",))
def simplenet_forward(x, params, return_feature=False):
    """SimpleNet.forward: f = backbone(x); y = classifier(f)."""
    B, C, H, W = x.shape
    w_conv, b_conv = params["w_conv"], params["b_conv"]
    w_cls, b_cls = params["w_cls"], params["b_cls"]
    fdim = w_conv.shape[0]
    num_classes = w_cls.shape[0]

    FP = _round_up(fdim, 128)            # lane-dense conv output channels
    NCP = _round_up(num_classes, 128)    # lane-dense logits
    n_out = H * W
    K9 = 9 * C

    # --- wrapper-side im2col: [B, H*W, 9C] bf16, patch order k = dy*3 + dx ---
    xp = jnp.transpose(x, (0, 2, 3, 1))                        # [B, H, W, C]
    xpad = jnp.pad(xp, ((0, 0), (1, 1), (1, 1), (0, 0)))       # [B, H+2, W+2, C]
    patches = [xpad[:, dy:dy + H, dx:dx + W, :] for dy in range(3) for dx in range(3)]
    xcol = jnp.concatenate(patches, axis=-1).reshape(B, n_out, K9).astype(jnp.bfloat16)

    # --- conv weights: OIHW [F,C,3,3] -> [9C, FP] bf16, same (dy,dx,c) ordering ---
    w9 = jnp.transpose(w_conv, (2, 3, 1, 0)).reshape(K9, fdim)
    w9 = jnp.pad(w9, ((0, 0), (0, FP - fdim))).astype(jnp.bfloat16)
    bconv = jnp.pad(b_conv, (0, FP - fdim)).reshape(1, FP).astype(jnp.float32)

    # --- classifier: [NC, F] -> [FP, NCP] bf16 (zero-padded rows/cols contribute 0) ---
    wc = jnp.pad(w_cls.T, ((0, FP - fdim), (0, NCP - num_classes))).astype(jnp.bfloat16)
    bcls = jnp.pad(b_cls, (0, NCP - num_classes)).reshape(1, NCP).astype(jnp.float32)

    # --- batch tiling ---
    Bt = _choose_bt(B, n_out, FP, K9)
    NB = -(-B // Bt)
    Bpad = NB * Bt
    if Bpad != B:
        xcol = jnp.pad(xcol, ((0, Bpad - B), (0, 0), (0, 0)))

    kernel = functools.partial(_simplenet_kernel, n_out=n_out, inv_hw=1.0 / float(n_out))

    flops = Bpad * (2 * n_out * K9 * FP + 2 * n_out * FP + 2 * FP * NCP)
    bytes_accessed = (xcol.size * 2 + w9.size * 2 + wc.size * 2
                      + (bconv.size + bcls.size) * 4 + Bpad * (NCP + FP) * 4)

    y3, f3 = pl.pallas_call(
        kernel,
        out_shape=(jax.ShapeDtypeStruct((NB, Bt, NCP), jnp.float32),
                   jax.ShapeDtypeStruct((NB, Bt, FP), jnp.float32)),
        grid=(NB,),
        in_specs=[
            pl.BlockSpec((Bt, n_out, K9), lambda b: (b, 0, 0)),   # per-step im2col slab
            pl.BlockSpec((K9, FP), lambda b: (0, 0)),             # conv taps (resident)
            pl.BlockSpec((1, FP), lambda b: (0, 0)),
            pl.BlockSpec((FP, NCP), lambda b: (0, 0)),            # classifier (resident)
            pl.BlockSpec((1, NCP), lambda b: (0, 0)),
        ],
        out_specs=(
            pl.BlockSpec((1, Bt, NCP), lambda b: (b, 0, 0)),
            pl.BlockSpec((1, Bt, FP), lambda b: (b, 0, 0)),
        ),
        compiler_params=pltpu.CompilerParams(
            dimension_semantics=("parallel",)),
        cost_estimate=pl.CostEstimate(flops=flops, transcendentals=0,
                                      bytes_accessed=bytes_accessed),
    )(xcol, w9, bconv, wc, bcls)

    y = y3.reshape(Bpad, NCP)[:B, :num_classes]
    if return_feature:
        f = f3.reshape(Bpad, FP)[:B, :fdim]
        return y, f
    return y


def init_params(key, in_channels, fdim, num_classes):
    k1, k2, k3, k4 = jax.random.split(key, 4)
    w_conv = 0.1 * jax.random.normal(k1, (fdim, in_channels, 3, 3), jnp.float32)
    b_conv = 0.1 * jax.random.normal(k2, (fdim,), jnp.float32)
    w_cls = 0.1 * jax.random.normal(k3, (num_classes, fdim), jnp.float32)
    b_cls = 0.1 * jax.random.normal(k4, (num_classes,), jnp.float32)
    return {"w_conv": w_conv, "b_conv": b_conv, "w_cls": w_cls, "b_cls": b_cls}


def reference_forward(x, params, conv_dtype=jnp.float32, cls_dtype=jnp.float32):
    """Pure-JAX reference (PyTorch Conv2d/ReLU/GAP/Linear semantics)."""
    w_conv, b_conv = params["w_conv"], params["b_conv"]
    w_cls, b_cls = params["w_cls"], params["b_cls"]
    conv = lax.conv_general_dilated(
        x.astype(conv_dtype), w_conv.astype(conv_dtype),
        window_strides=(1, 1), padding="SAME",
        dimension_numbers=("NCHW", "OIHW", "NCHW"),
        preferred_element_type=jnp.float32)
    conv = jnp.maximum(conv + b_conv[None, :, None, None], 0.0)
    f = jnp.mean(conv, axis=(2, 3))                              # [B, fdim]
    y = jnp.dot(f.astype(cls_dtype), w_cls.T.astype(cls_dtype),
                preferred_element_type=jnp.float32) + b_cls
    return y, f


if __name__ == "__main__":
    B, C, H, W = 2, 4, 16, 16
    fdim, num_classes = 32, 8

    key = jax.random.PRNGKey(0)
    kx, kp = jax.random.split(key)
    x = jax.random.normal(kx, (B, C, H, W), jnp.float32)
    params = init_params(kp, C, fdim, num_classes)

    y, f = jax.block_until_ready(simplenet_forward(x, params, return_feature=True))
    y_only = jax.block_until_ready(simplenet_forward(x, params))

    assert y.shape == (B, num_classes) and f.shape == (B, fdim)
    assert y_only.shape == (B, num_classes)
    assert jnp.allclose(y, y_only, atol=1e-6, rtol=1e-6)

    # reference matched to the kernel's operand quantization (bf16 conv + bf16 classifier)
    y_bf, f_bf = reference_forward(x, params, conv_dtype=jnp.bfloat16, cls_dtype=jnp.bfloat16)
    assert jnp.allclose(f, f_bf, atol=2e-3, rtol=2e-3), "features mismatch vs bf16 reference"
    assert jnp.allclose(y, y_bf, atol=3e-3, rtol=3e-3), "logits mismatch vs bf16 reference"

    # full-f32 reference sanity check (difference is bf16 operand quantization only)
    y_f32, f_f32 = reference_forward(x, params)
    assert jnp.allclose(y, y_f32, atol=5e-2, rtol=5e-2), "logits mismatch vs f32 reference"
    assert jnp.allclose(f, f_f32, atol=5e-2, rtol=5e-2), "features mismatch vs f32 reference"

    # TODO(synk): `self.head` is None and LinearWithConstraint's max_norm is a train-time
    #             weight renorm, so neither emits kernel code.
    print("KERNEL_OK")
</pallas_src>

<mosaic_0001>
module attributes {stable_mosaic.version = 11 : i64} {
  func.func @_simplenet_kernel(%arg0: i32, %arg1: memref<1x256x36xbf16, #tpu.memory_space<vmem>>, %arg2: memref<36x128xbf16, #tpu.memory_space<vmem>>, %arg3: memref<1x128xf32, #tpu.memory_space<vmem>>, %arg4: memref<128x128xbf16, #tpu.memory_space<vmem>>, %arg5: memref<1x128xf32, #tpu.memory_space<vmem>>, %arg6: memref<1x1x128xf32, #tpu.memory_space<vmem>>, %arg7: memref<1x1x128xf32, #tpu.memory_space<vmem>>) attributes {dimension_semantics = [#tpu.dimension_semantics<parallel>], iteration_bounds = array<i64: 2>, scalar_prefetch = 0 : i64, scratch_operands = 0 : i64, tpu.core_type = #tpu.core_type<tc>, window_params = [{transform_indices = @transform_0, window_bounds = array<i64: 1, 256, 36>}, {pipeline_mode = #tpu.pipeline_mode<synchronous>, transform_indices = @transform_1, window_bounds = array<i64: 36, 128>}, {pipeline_mode = #tpu.pipeline_mode<synchronous>, transform_indices = @transform_2, window_bounds = array<i64: 1, 128>}, {pipeline_mode = #tpu.pipeline_mode<synchronous>, transform_indices = @transform_3, window_bounds = array<i64: 128, 128>}, {pipeline_mode = #tpu.pipeline_mode<synchronous>, transform_indices = @transform_4, window_bounds = array<i64: 1, 128>}, {transform_indices = @transform_5, window_bounds = array<i64: 1, 1, 128>}, {transform_indices = @transform_6, window_bounds = array<i64: 1, 1, 128>}]} {
    %c0 = arith.constant 0 : index
    %c0_0 = arith.constant 0 : index
    %c0_1 = arith.constant 0 : index
    %0 = vector.load %arg1[%c0, %c0_0, %c0_1] : memref<1x256x36xbf16, #tpu.memory_space<vmem>>, vector<1x256x36xbf16>
    %1 = vector.shape_cast %0 : vector<1x256x36xbf16> to vector<256x36xbf16>
    %c0_2 = arith.constant 0 : index
    %c0_3 = arith.constant 0 : index
    %2 = vector.load %arg2[%c0_2, %c0_3] : memref<36x128xbf16, #tpu.memory_space<vmem>>, vector<36x128xbf16>
    %cst = arith.constant dense<0.000000e+00> : vector<256x128xf32>
    %3 = tpu.matmul %1, %2, %cst {dimension_numbers = #tpu.dot_dimension_numbers<[1], [0], [0], [1], [0, 0, 1, 1], [], []>} : vector<256x36xbf16>, vector<36x128xbf16>, vector<256x128xf32> -> vector<256x128xf32>
    %c0_4 = arith.constant 0 : index
    %c0_5 = arith.constant 0 : index
    %4 = vector.load %arg3[%c0_4, %c0_5] : memref<1x128xf32, #tpu.memory_space<vmem>>, vector<1x128xf32>
    %5 = vector.broadcast %4 : vector<1x128xf32> to vector<256x128xf32>
    %6 = arith.addf %3, %5 : vector<256x128xf32>
    %cst_6 = arith.constant 0.000000e+00 : f32
    %7 = vector.broadcast %cst_6 : f32 to vector<256x128xf32>
    %8 = arith.maximumf %6, %7 : vector<256x128xf32>
    %cst_7 = arith.constant dense<0.000000e+00> : vector<128xf32>
    %9 = vector.multi_reduction <add>, %8, %cst_7 [0] : vector<256x128xf32> to vector<128xf32>
    %10 = vector.shape_cast %9 : vector<128xf32> to vector<1x128xf32>
    %cst_8 = arith.constant 3.906250e-03 : f32
    %11 = vector.broadcast %cst_8 : f32 to vector<1x128xf32>
    %12 = arith.mulf %10, %11 : vector<1x128xf32>
    %c0_9 = arith.constant 0 : index
    %c0_10 = arith.constant 0 : index
    %c0_11 = arith.constant 0 : index
    %13 = vector.load %arg7[%c0_9, %c0_10, %c0_11] : memref<1x1x128xf32, #tpu.memory_space<vmem>>, vector<1x1x128xf32>
    %14 = vector.shape_cast %13 : vector<1x1x128xf32> to vector<1x128xf32>
    %15 = vector.shape_cast %12 : vector<1x128xf32> to vector<1x1x128xf32>
    tpu.vector_store %arg7[%c0_9, %c0_10, %c0_11], %15 {strides = array<i32>} : memref<1x1x128xf32, #tpu.memory_space<vmem>>, vector<1x1x128xf32>,
    %16 = arith.truncf %12 : vector<1x128xf32> to vector<1x128xbf16>
    %c0_12 = arith.constant 0 : index
    %c0_13 = arith.constant 0 : index
    %17 = vector.load %arg4[%c0_12, %c0_13] : memref<128x128xbf16, #tpu.memory_space<vmem>>, vector<128x128xbf16>
    %cst_14 = arith.constant dense<0.000000e+00> : vector<1x128xf32>
    %18 = tpu.matmul %16, %17, %cst_14 {dimension_numbers = #tpu.dot_dimension_numbers<[1], [0], [0], [1], [0, 0, 1, 1], [], []>} : vector<1x128xbf16>, vector<128x128xbf16>, vector<1x128xf32> -> vector<1x128xf32>
    %c0_15 = arith.constant 0 : index
    %c0_16 = arith.constant 0 : index
    %19 = vector.load %arg5[%c0_15, %c0_16] : memref<1x128xf32, #tpu.memory_space<vmem>>, vector<1x128xf32>
    %20 = arith.addf %18, %19 : vector<1x128xf32>
    %c0_17 = arith.constant 0 : index
    %c0_18 = arith.constant 0 : index
    %c0_19 = arith.constant 0 : index
    %21 = vector.load %arg6[%c0_17, %c0_18, %c0_19] : memref<1x1x128xf32, #tpu.memory_space<vmem>>, vector<1x1x128xf32>
    %22 = vector.shape_cast %21 : vector<1x1x128xf32> to vector<1x128xf32>
    %23 = vector.shape_cast %20 : vector<1x128xf32> to vector<1x1x128xf32>
    tpu.vector_store %arg6[%c0_17, %c0_18, %c0_19], %23 {strides = array<i32>} : memref<1x1x128xf32, #tpu.memory_space<vmem>>, vector<1x1x128xf32>,
    return
  }
  func.func @transform_0(%arg0: i32) -> (i32, i32, i32) {
    %c0_i32 = arith.constant 0 : i32
    %c0_i32_0 = arith.constant 0 : i32
    %c0_i32_1 = arith.constant 0 : i32
    return %arg0, %c0_i32, %c0_i32_0 : i32, i32, i32
  }
  func.func @transform_1(%arg0: i32) -> (i32, i32) {
    %c0_i32 = arith.constant 0 : i32
    %c0_i32_0 = arith.constant 0 : i32
    %c0_i32_1 = arith.constant 0 : i32
    return %c0_i32, %c0_i32_0 : i32, i32
  }
  func.func @transform_2(%arg0: i32) -> (i32, i32) {
    %c0_i32 = arith.constant 0 : i32
    %c0_i32_0 = arith.constant 0 : i32
    %c0_i32_1 = arith.constant 0 : i32
    return %c0_i32, %c0_i32_0 : i32, i32
  }
  func.func @transform_3(%arg0: i32) -> (i32, i32) {
    %c0_i32 = arith.constant 0 : i32
    %c0_i32_0 = arith.constant 0 : i32
    %c0_i32_1 = arith.constant 0 : i32
    return %c0_i32, %c0_i32_0 : i32, i32
  }
  func.func @transform_4(%arg0: i32) -> (i32, i32) {
    %c0_i32 = arith.constant 0 : i32
    %c0_i32_0 = arith.constant 0 : i32
    %c0_i32_1 = arith.constant 0 : i32
    return %c0_i32, %c0_i32_0 : i32, i32
  }
  func.func @transform_5(%arg0: i32) -> (i32, i32, i32) {
    %c0_i32 = arith.constant 0 : i32
    %c0_i32_0 = arith.constant 0 : i32
    %c0_i32_1 = arith.constant 0 : i32
    return %arg0, %c0_i32, %c0_i32_0 : i32, i32, i32
  }
  func.func @transform_6(%arg0: i32) -> (i32, i32, i32) {
    %c0_i32 = arith.constant 0 : i32
    %c0_i32_0 = arith.constant 0 : i32
    %c0_i32_1 = arith.constant 0 : i32
    return %arg0, %c0_i32, %c0_i32_0 : i32, i32, i32
  }
}

</mosaic_0001>

<bundles_post_ra>
// kernel: simplenet_forward.1
= control target key start
LH: loop header
LB: loop body
LE: loop exit
PB: predicated region body
PF: predicated region fallthrough
CT: control target
= control target key end

     0   :  { %12 = vsyncpa [#allocation3], 0  ;;  %s1493_s0 = inlined_call_operand.vmem [shape: bf16[2,256,36], index: 0, kind: input, shape index: {}]   ;;  %s1494_s1 = inlined_call_operand.vmem [shape: bf16[36,128], index: 1, kind: input, shape index: {}]   ;;  %s1495_s2 = inlined_call_operand.vmem [shape: f32[1,128], index: 2, kind: input, shape index: {}]   ;;  %s1496_s3 = inlined_call_operand.vmem [shape: bf16[128,128], index: 3, kind: input, shape index: {}]   ;;  %s1497_s4 = inlined_call_operand.vmem [shape: f32[1,128], index: 4, kind: input, shape index: {}]   ;;  %s1498_s5 = inlined_call_operand.hbm [shape: f32[2,1,128], index: 5, kind: output, shape index: {0}]   ;;  %s1499_s6 = inlined_call_operand.hbm [shape: f32[2,1,128], index: 6, kind: output, shape index: {1}]  }
   0x1   :  { %14 = vsyncpa [#allocation3 + $0x1], 0 }
   0x2   :  { %15 = vsyncpa [#allocation5], 0 }
   0x3   :  { %17 = vsyncpa [#allocation5 + $0x1], 0  ;;  %s1254_s21 = smov 0   ;;  %s1256_s22 = smov 0  }
   0x4   :  { %s1258_s23 = smov 0   ;;  %s1260_s24 = smov 0  }
   0x5 LB: > { %s1275_s25 = sadd.s32 4294967295, %s1213_s24   ;;  %s904_s26 = sadd.s32 4294967294, %s1213_s24   ;;  %s1213_s24 = sphi %s1260_s24, %s1505_s24   ;;  %s1209_s23 = sphi %s1258_s23, %s1504_s23   ;;  %s1205_s22 = sphi %s1256_s22, %s1503_s22   ;;  %s1201_s21 = sphi %s1254_s21, %s1502_s21  }
   0x6   : > { %s1279_s27 = sadd.s32 1, %s1213_s24   ;;  %s140_s28 = sadd.s32 1, %s1209_s23 }
   0x7   : > { %s137_s29 = ssub.s32 %s1213_s24, %s1279_s27  ;;  %p150_p0 = scmp.ne.s32.totalorder %s1209_s23, %s1205_s22 }
   0x8   : > { %p138_p1 = scmp.eq.s32.totalorder %s137_s29, 0  ;;  %p151_p2 = scmp.eq.s32.totalorder %s1275_s25, 1 }
   0x9   : > { %p156_p3 = scmp.ne.s32.totalorder %s1205_s22, %s1201_s21  ;;  %p157_p4 = scmp.eq.s32.totalorder %s904_s26, 1 }
   0xa   : > { %s1290_s30 = scalar_select %p138_p1, %s1209_s23, %s140_s28  }
   0xb   : > { %p1292_p5 = por %p151_p2, %p150_p0  ;;  %p1296_p6 = por %p157_p4, %p156_p3 }
   0xc   : > { %p907_p7 = scmp.ge.s32.totalorder %s1213_s24, 1  ;;  %p221_p8 = scmp.lt.s32.totalorder %s1213_s24, 3 }
   0xe   : > { %p222_p9 = pnand %p907_p7, %p221_p8 }
   0xf   : > { %v1092_v0 = vld [vmem:[%s1494_s1] sm:$0xff] (!%p222_p9)   ;;  %v1093_v1 = vld [vmem:[%s1494_s1 + $0x8] sm:$0xff] (!%p222_p9)   ;;  %p254_p10 = scmp.lt.s32.totalorder (!%p222_p9), %s1275_s25, 1  ;;  %v1094_v2 = vld [vmem:[%s1494_s1 + $0x10] ss:$0 sps:$4 sm:$0x33] (!%p222_p9)  }
  0x10   : > { %225 = sbr.rel (%p222_p9) target bundleno = 554 (0x22a), region = 40  ;;  %987 = vmatprep.subr.bf16.mxu0 (!%p222_p9), %v1092_v0  ;;  %vm448_vm0 = vcmask (!%p222_p9), 1041408   ;;  %vm399_vm1 = vcmask (!%p222_p9), 293888   ;;  %v1111_v20 = vld [vmem:[%s1496_s3] sm:$0xff] (!%p222_p9)   ;;  %v1215_v21 = vmov (!%p222_p9), 0.0   ;;  %v1112_v22 = vld [vmem:[%s1496_s3 + $0x8] sm:$0xff] (!%p222_p9)  }
  0x11   : > { %988 = vmatpush3.bf16.msra.mxu0 (!%p222_p9), %v1092_v0  ;;  %v450_v4 = vsel (!%p222_p9), %vm448_vm0, %v1094_v2, 0  ;;  %1025 = vmatprep.subr.bf16.mxu1 (!%p222_p9), %v1215_v21  ;;  %v1113_v23 = vld [vmem:[%s1496_s3 + $0x10] sm:$0xff] (!%p222_p9)   ;;  %v1114_v24 = vld [vmem:[%s1496_s3 + $0x18] sm:$0xff] (!%p222_p9)   ;;  %v1115_v25 = vld [vmem:[%s1496_s3 + $0x20] sm:$0xff] (!%p222_p9)   ;;  %vm1216_vm2 = vmmov (!%p222_p9), 0   ;;  %s1412_s29 = sand.u32 (!%p222_p9), 1, %s1205_s22  }
  0x12   : > { %989 = vmatprep.subr.bf16.mxu0 (!%p222_p9), %v1093_v1  ;;  %1026 = vmatpush3.bf16.msra.mxu1 (!%p222_p9), %v1111_v20  ;;  %v1116_v26 = vld [vmem:[%s1496_s3 + $0x28] sm:$0xff] (!%p222_p9)   ;;  %v1117_v27 = vld [vmem:[%s1496_s3 + $0x30] sm:$0xff] (!%p222_p9)   ;;  %v1118_v28 = vld [vmem:[%s1496_s3 + $0x38] sm:$0xff] (!%p222_p9)   ;;  %s253_s9 = scalar_lea.vmem (!%p222_p9), [#allocation4], %s1412_s29  ;;  %s954_s10 = sshll.u32 (!%p222_p9), %s1275_s25, 4 }
  0x13   : > { %1027 = vmatprep.subr.bf16.mxu1 (!%p222_p9), %v1215_v21  ;;  %1041 = vmatprep.mubr.msk.bf16.mxu1 (!%p222_p9), %vm1216_vm2, %v1215_v21  ;;  %v1377_v29 = vld [vmem:[%s1495_s2] ss:$0 sm:$0xff] (!%p222_p9)  ;;  %s1421_s13 = scalar_lea.hbm (!%p222_p9), %s1499_s6, %s954_s10  ;;  %s821_s14 = sshll.u32 (!%p222_p9), %s253_s9, 4  ;;  %s822_s14 = int_to_ptr.vmem [resolvable:$true] %s821_s14 }
  0x14   : > { %s1217_s17 = smov (!%p222_p9), [#allocation4]  }
  0x15   : > { %990 = vmatpush3.bf16.msra.mxu0 (!%p222_p9), %v1093_v1  ;;  %s1123_s18 = sshll.u32 (!%p222_p9), %s1217_s17, 4  ;;  %s1124_s18 = int_to_ptr.vmem [resolvable:$false] %s1123_s18 }
  0x16   : > { %1045 = vmatprep.subr.msk.bf16.mxu0 (!%p222_p9), %vm448_vm0, %v1094_v2  ;;  %1028 = vmatpush3.bf16.msra.mxu1 (!%p222_p9), %v1112_v22  ;;  %p1126_p0 = scmp.lt.s32.totalorder (!%p222_p9), %s822_s14, %s1124_s18 }
  0x17   : > { %s255_s15 = scalar_select %p254_p10, %s1275_s25, 1  ;;  %1029 = vmatprep.subr.bf16.mxu1 %v1215_v21 }
  0x19   : > { %s958_s16 = sshll.u32 %s255_s15, 7  ;;  %992 = vmatpush3.bf16.msra.mxu0 %v450_v4  ;;  %s796_s15 = scalar_lea.sflag [#allocation5], %s1412_s29 }
  0x1a   : > { %s1316_s19 = scalar_lea.vmem %s1493_s0, %s958_s16  ;;  %1030 = vmatpush3.bf16.msra.mxu1 %v1113_v23  ;;  %s1119_s16 = scalar_lea.vmem %s822_s14, 16 }
  0x1b   : > { %v1095_v3 = vld [vmem:[%s1316_s19] sm:$0xff]   ;;  %v1096_v5 = vld [vmem:[%s1316_s19 + $0x8] sm:$0xff]   ;;  %v1097_v6 = vld [vmem:[%s1316_s19 + $0x10] sm:$0xff]   ;;  %1031 = vmatprep.subr.bf16.mxu1 %v1215_v21  ;;  %p1120_p11 = scmp.ne.s32.totalorder %s822_s14, %s1119_s16 }
  0x1c   : > { %993 = vmatprep.mubr.msk.bf16.mxu0 %vm399_vm1, %v1095_v3  ;;  %v1098_v7 = vld [vmem:[%s1316_s19 + $0x18] sm:$0xff]   ;;  %v1099_v8 = vld [vmem:[%s1316_s19 + $0x20] sm:$0xff]   ;;  %v1100_v9 = vld [vmem:[%s1316_s19 + $0x28] sm:$0xff]  }
  0x1d   : > { %994 = vmatmul.mubr.msk.bf16.vlgmr.msra.gmra.mrb[0].mxu0 %vm399_vm1, %v1096_v5  ;;  %v1101_v10 = vld [vmem:[%s1316_s19 + $0x30] sm:$0xff]   ;;  %v1102_v11 = vld [vmem:[%s1316_s19 + $0x38] sm:$0xff]   ;;  %v1103_v12 = vld [vmem:[%s1316_s19 + $0x40] sm:$0xff]   ;;  %p1121_p12 = pnand %p1120_p11, %p1292_p5 }
  0x1e   : > { %997 = vmatprep.mubr.msk.bf16.mxu0 %vm399_vm1, %v1097_v6  ;;  %v1104_v13 = vld [vmem:[%s1316_s19 + $0x48] sm:$0xff]   ;;  %v1105_v14 = vld [vmem:[%s1316_s19 + $0x50] sm:$0xff]   ;;  %v1106_v15 = vld [vmem:[%s1316_s19 + $0x58] sm:$0xff]   ;;  %1032 = vmatpush3.bf16.msra.mxu1 %v1114_v24 }
  0x1f   : > { %v1107_v16 = vld [vmem:[%s1316_s19 + $0x60] sm:$0xff]   ;;  %v1108_v17 = vld [vmem:[%s1316_s19 + $0x68] sm:$0xff]   ;;  %v1109_v18 = vld [vmem:[%s1316_s19 + $0x70] sm:$0xff]   ;;  %1033 = vmatprep.subr.bf16.mxu1 %v1215_v21  ;;  %p1122_p13 = pneg %p1121_p12 }
  0x20   : > { %v1110_v19 = vld [vmem:[%s1316_s19 + $0x78] sm:$0xff]   ;;  %s1125_s19 = scalar_lea.vmem %s1124_s18, 32 }
  0x21   : > { %p1127_p1 = scmp.lt.s32.totalorder %s1125_s19, %s1119_s16 }
  0x22   : > { %1034 = vmatpush3.bf16.msra.mxu1 %v1115_v25 }
  0x23   : > { %1035 = vmatprep.subr.bf16.mxu1 %v1215_v21  ;;  %p1128_p2 = por %p1127_p1, %p1126_p0 }
  0x25   : > { %998 = vmatmul.mubr.msk.bf16.gmra.mrb[4].mxu0 %vm399_vm1, %v1098_v7  ;;  %p1129_p3 = pnand %p1128_p2, %p1122_p13 }
  0x26   : > { %1001 = vmatprep.mubr.msk.bf16.mxu0 %vm399_vm1, %v1099_v8  ;;  %1036 = vmatpush3.bf16.msra.mxu1 %v1116_v26 }
  0x27   : > { %1037 = vmatprep.subr.bf16.mxu1 %v1215_v21 }
  0x2a   : > { %1038 = vmatpush3.bf16.msra.mxu1 %v1117_v27 }
  0x2b   : > { %1039 = vmatprep.subr.bf16.mxu1 %v1215_v21 }
  0x2d   : > { %1002 = vmatmul.mubr.msk.bf16.gmra.mrb[8].mxu0 %vm399_vm1, %v1100_v9 }
  0x2e   : > { %1005 = vmatprep.mubr.msk.bf16.mxu0 %vm399_vm1, %v1101_v10  ;;  %1040 = vmatpush3.bf16.msra.mxu1 %v1118_v28 }
  0x35   : > { %1006 = vmatmul.mubr.msk.bf16.gmra.mrb[12].mxu0 %vm399_vm1, %v1102_v11 }
  0x36   : > { %1009 = vmatprep.mubr.msk.bf16.mxu0 %vm399_vm1, %v1103_v12 }
  0x3d   : > { %1010 = vmatmul.mubr.msk.bf16.gmra.mrb[16].mxu0 %vm399_vm1, %v1104_v13 }
  0x3e   : > { %1013 = vmatprep.mubr.msk.bf16.mxu0 %vm399_vm1, %v1105_v14 }
  0x45   : > { %1014 = vmatmul.mubr.msk.bf16.gmra.mrb[20].mxu0 %vm399_vm1, %v1106_v15 }
  0x46   : > { %1017 = vmatprep.mubr.msk.bf16.mxu0 %vm399_vm1, %v1107_v16 }
  0x4d   : > { %1018 = vmatmul.mubr.msk.bf16.gmra.mrb[24].mxu0 %vm399_vm1, %v1108_v17 }
  0x4e   : > { %1021 = vmatprep.mubr.msk.bf16.mxu0 %vm399_vm1, %v1109_v18 }
  0x55   : > { %1022 = vmatmul.mubr.msk.bf16.gmra.mrb[28].mxu0 %vm399_vm1, %v1110_v19 }
  0xf0   : > { %v995_v30 = vpop.f32.mrb[0].mxu0 }
  0xf1   : > { %v486_v31 = vpop.f32.mrb[1].mxu0  ;;  %v495_v35 = vadd.f32 %v995_v30, %v1377_v29 }
  0xf2   : > { %v487_v32 = vadd.f32 %v1377_v29, %v486_v31  ;;  %v996_v33 = vpop.f32.mrb[2].mxu0 }
  0xf3   : > { %v489_v34 = vpop.f32.mrb[3].mxu0  ;;  %v498_v38 = vadd.f32 %v996_v33, %v1377_v29  ;;  %v615_v40 = vmax.f32 %v495_v35, 0.0 }
  0xf4   : > { %v490_v36 = vadd.f32 %v1377_v29, %v489_v34  ;;  %v613_v37 = vmax.f32 %v487_v32, 0.0 }
  0xf5   : > { %v616_v44 = vmax.f32 %v498_v38, 0.0 }
  0xf6   : > { %v614_v39 = vmax.f32 %v490_v36, 0.0 }
  0xf8   : > { %v645_v41 = vadd.f32 %v614_v39, %v613_v37  ;;  %v999_v42 = vpop.f32.mrb[4].mxu0 }
  0xf9   : > { %v502_v43 = vpop.f32.mrb[5].mxu0  ;;  %v511_v49 = vadd.f32 %v999_v42, %v1377_v29 }
  0xfa   : > { %v646_v45 = vadd.f32 %v645_v41, %v615_v40  ;;  %v503_v46 = vadd.f32 %v1377_v29, %v502_v43  ;;  %v1000_v47 = vpop.f32.mrb[6].mxu0 }
  0xfb   : > { %v505_v48 = vpop.f32.mrb[7].mxu0  ;;  %v514_v54 = vadd.f32 %v1000_v47, %v1377_v29  ;;  %v619_v56 = vmax.f32 %v511_v49, 0.0 }
  0xfc   : > { %v617_v50 = vmax.f32 %v503_v46, 0.0  ;;  %v647_v51 = vadd.f32 %v646_v45, %v616_v44  ;;  %v506_v52 = vadd.f32 %v1377_v29, %v505_v48 }
  0xfd   : > { %v620_v60 = vmax.f32 %v514_v54, 0.0 }
  0xfe   : > { %v648_v53 = vadd.f32 %v647_v51, %v617_v50  ;;  %v618_v55 = vmax.f32 %v506_v52, 0.0 }
 0x100   : > { %v649_v57 = vadd.f32 %v648_v53, %v618_v55  ;;  %v1003_v58 = vpop.f32.mrb[8].mxu0 }
 0x101   : > { %v518_v59 = vpop.f32.mrb[9].mxu0  ;;  %v527_v1 = vadd.f32 %v1003_v58, %v1377_v29 }
 0x102   : > { %v650_v61 = vadd.f32 %v649_v57, %v619_v56  ;;  %v519_v62 = vadd.f32 %v1377_v29, %v518_v59  ;;  %v1004_v63 = vpop.f32.mrb[10].mxu0 }
 0x103   : > { %v521_v0 = vpop.f32.mrb[11].mxu0  ;;  %v530_v6 = vadd.f32 %v1004_v63, %v1377_v29  ;;  %v623_v8 = vmax.f32 %v527_v1, 0.0 }
 0x104   : > { %v621_v2 = vmax.f32 %v519_v62, 0.0  ;;  %v651_v3 = vadd.f32 %v650_v61, %v620_v60  ;;  %v522_v4 = vadd.f32 %v1377_v29, %v521_v0 }
 0x105   : > { %v624_v12 = vmax.f32 %v530_v6, 0.0 }
 0x106   : > { %v652_v5 = vadd.f32 %v651_v3, %v621_v2  ;;  %v622_v7 = vmax.f32 %v522_v4, 0.0 }
 0x108   : > { %v653_v9 = vadd.f32 %v652_v5, %v622_v7  ;;  %v1007_v10 = vpop.f32.mrb[12].mxu0 }
 0x109   : > { %v534_v11 = vpop.f32.mrb[13].mxu0  ;;  %v543_v17 = vadd.f32 %v1007_v10, %v1377_v29 }
 0x10a   : > { %v654_v13 = vadd.f32 %v653_v9, %v623_v8  ;;  %v535_v14 = vadd.f32 %v1377_v29, %v534_v11  ;;  %v1008_v15 = vpop.f32.mrb[14].mxu0 }
 0x10b   : > { %v537_v16 = vpop.f32.mrb[15].mxu0  ;;  %v546_v22 = vadd.f32 %v1008_v15, %v1377_v29  ;;  %v627_v24 = vmax.f32 %v543_v17, 0.0 }
 0x10c   : > { %v625_v18 = vmax.f32 %v535_v14, 0.0  ;;  %v655_v19 = vadd.f32 %v654_v13, %v624_v12  ;;  %v538_v20 = vadd.f32 %v1377_v29, %v537_v16 }
 0x10d   : > { %v628_v28 = vmax.f32 %v546_v22, 0.0 }
 0x10e   : > { %v656_v21 = vadd.f32 %v655_v19, %v625_v18  ;;  %v626_v23 = vmax.f32 %v538_v20, 0.0 }
 0x110   : > { %v657_v25 = vadd.f32 %v656_v21, %v626_v23  ;;  %v1011_v26 = vpop.f32.mrb[16].mxu0 }
 0x111   : > { %v550_v27 = vpop.f32.mrb[17].mxu0  ;;  %v559_v34 = vadd.f32 %v1011_v26, %v1377_v29 }
 0x112   : > { %v658_v30 = vadd.f32 %v657_v25, %v627_v24  ;;  %v551_v31 = vadd.f32 %v1377_v29, %v550_v27  ;;  %v1012_v32 = vpop.f32.mrb[18].mxu0 }
 0x113   : > { %v553_v33 = vpop.f32.mrb[19].mxu0  ;;  %v562_v39 = vadd.f32 %v1012_v32, %v1377_v29  ;;  %v631_v41 = vmax.f32 %v559_v34, 0.0 }
 0x114   : > { %v629_v35 = vmax.f32 %v551_v31, 0.0  ;;  %v659_v36 = vadd.f32 %v658_v30, %v628_v28  ;;  %v554_v37 = vadd.f32 %v1377_v29, %v553_v33 }
 0x115   : > { %v632_v45 = vmax.f32 %v562_v39, 0.0 }
 0x116   : > { %v660_v38 = vadd.f32 %v659_v36, %v629_v35  ;;  %v630_v40 = vmax.f32 %v554_v37, 0.0 }
 0x118   : > { %v661_v42 = vadd.f32 %v660_v38, %v630_v40  ;;  %v1015_v43 = vpop.f32.mrb[20].mxu0 }
 0x119   : > { %v566_v44 = vpop.f32.mrb[21].mxu0  ;;  %v575_v50 = vadd.f32 %v1015_v43, %v1377_v29 }
 0x11a   : > { %v662_v46 = vadd.f32 %v661_v42, %v631_v41  ;;  %v567_v47 = vadd.f32 %v1377_v29, %v566_v44  ;;  %v1016_v48 = vpop.f32.mrb[22].mxu0 }
 0x11b   : > { %v569_v49 = vpop.f32.mrb[23].mxu0  ;;  %v578_v55 = vadd.f32 %v1016_v48, %v1377_v29  ;;  %v635_v57 = vmax.f32 %v575_v50, 0.0 }
 0x11c   : > { %v633_v51 = vmax.f32 %v567_v47, 0.0  ;;  %v663_v52 = vadd.f32 %v662_v46, %v632_v45  ;;  %v570_v53 = vadd.f32 %v1377_v29, %v569_v49 }
 0x11d   : > { %v636_v61 = vmax.f32 %v578_v55, 0.0 }
 0x11e   : > { %v664_v54 = vadd.f32 %v663_v52, %v633_v51  ;;  %v634_v56 = vmax.f32 %v570_v53, 0.0 }
 0x120   : > { %v665_v58 = vadd.f32 %v664_v54, %v634_v56  ;;  %v1019_v59 = vpop.f32.mrb[24].mxu0 }
 0x121   : > { %v582_v60 = vpop.f32.mrb[25].mxu0  ;;  %v591_v2 = vadd.f32 %v1019_v59, %v1377_v29 }
 0x122   : > { %v666_v62 = vadd.f32 %v665_v58, %v635_v57  ;;  %v583_v63 = vadd.f32 %v1377_v29, %v582_v60  ;;  %v1020_v0 = vpop.f32.mrb[26].mxu0 }
 0x123   : > { %v585_v1 = vpop.f32.mrb[27].mxu0  ;;  %v594_v7 = vadd.f32 %v1020_v0, %v1377_v29  ;;  %v639_v9 = vmax.f32 %v591_v2, 0.0 }
 0x124   : > { %v637_v3 = vmax.f32 %v583_v63, 0.0  ;;  %v667_v4 = vadd.f32 %v666_v62, %v636_v61  ;;  %v586_v5 = vadd.f32 %v1377_v29, %v585_v1 }
 0x125   : > { %v640_v13 = vmax.f32 %v594_v7, 0.0 }
 0x126   : > { %v668_v6 = vadd.f32 %v667_v4, %v637_v3  ;;  %v638_v8 = vmax.f32 %v586_v5, 0.0 }
 0x128   : > { %v669_v10 = vadd.f32 %v668_v6, %v638_v8  ;;  %v1023_v11 = vpop.f32.mrb[28].mxu0 }
 0x129   : > { %v598_v12 = vpop.f32.mrb[29].mxu0  ;;  %v607_v18 = vadd.f32 %v1023_v11, %v1377_v29 }
 0x12a   : > { %v670_v14 = vadd.f32 %v669_v10, %v639_v9  ;;  %v599_v15 = vadd.f32 %v1377_v29, %v598_v12  ;;  %v1024_v16 = vpop.f32.mrb[30].mxu0 }
 0x12b   : > { %v601_v17 = vpop.f32.mrb[31].mxu0  ;;  %v610_v23 = vadd.f32 %v1024_v16, %v1377_v29  ;;  %v643_v25 = vmax.f32 %v607_v18, 0.0 }
 0x12c   : > { %v641_v19 = vmax.f32 %v599_v15, 0.0  ;;  %v671_v20 = vadd.f32 %v670_v14, %v640_v13  ;;  %v602_v21 = vadd.f32 %v1377_v29, %v601_v17 }
 0x12d   : > { %v644_v27 = vmax.f32 %v610_v23, 0.0 }
 0x12e   : > { %v672_v22 = vadd.f32 %v671_v20, %v641_v19  ;;  %v642_v24 = vmax.f32 %v602_v21, 0.0 }
 0x130   : > { %v673_v26 = vadd.f32 %v672_v22, %v642_v24 }
 0x132   : > { %v674_v28 = vadd.f32 %v673_v26, %v643_v25 }
 0x134   : > { %v675_v30 = vadd.f32 %v674_v28, %v644_v27 }
 0x136   : > { %v676_v31 = vrot.slane %v675_v30, 4 }
 0x138   : > { %v677_v32 = vadd.f32 %v676_v31, %v675_v30 }
 0x13a   : > { %v678_v33 = vrot.slane %v677_v32, 2 }
 0x13c   : > { %v679_v34 = vadd.f32 %v678_v33, %v677_v32 }
 0x13e   : > { %v680_v35 = vrot.slane %v679_v34, 1 }
 0x140   : > { %v681_v36 = vadd.f32 %v680_v35, %v679_v34 }
 0x142   : > { %v682_v29 = vmul.f32 0.00390625, %v681_v36 }
 0x144   : > { %v684_v37 = vpack.c.bf16 %v682_v29, %v682_v29  ;;  %683 = vst [vmem:[%s253_s9] sm:$0x1] %v682_v29 }
 0x146   : > { %1042 = vmatmul.mubr.bf16.vlgmr.msra.gmra.mrb[0].mxu1 %v684_v37 }
 0x147   : > { %1132 = shalt.err (!%p1129_p3)
}
 0x148   : > { %s1133_s20 = scalar_lea.hbm %s1421_s13, 16  ;;  %s1137_s9 = scalar_lea.hbm %s1499_s6, 32 }
 0x149   : > { %p1134_p4 = scmp.ne.s32.totalorder %s1421_s13, %s1133_s20  ;;  %p1138_p9 = scmp.lt.u32.totalorder %s1421_s13, %s1499_s6 }
 0x14a   : > { %p1139_p10 = scmp.lt.u32.totalorder %s1137_s9, %s1133_s20  ;;  %p1141_p12 = scmp.lt.u32.totalorder %s1133_s20, %s1421_s13 }
 0x14b   : > { %p1135_p7 = pnand %p1134_p4, %p1292_p5 }
 0x14c   : > { %p1140_p11 = por %p1139_p10, %p1138_p9 }
 0x14d   : > { %p1136_p8 = pneg %p1135_p7 }
 0x14e   : > { %p1142_p13 = por %p1141_p12, %p1140_p11 }
 0x150   : > { %p1143_p0 = pnand %p1142_p13, %p1136_p8 }
 0x152   : > { %1146 = shalt.err (!%p1143_p0)
}
 0x153   : > { %1047 = dma.vmem_to_hbm [thread:$0]  (%p1292_p5), %s822_s14, 16, %s1421_s13, %s796_s15   ;;  %v701_v38 = vld [vmem:[%s1497_s4] sm:$0x1] }
 0x154   : > { %s247_s18 = scalar_lea.vmem [#allocation2], %s1412_s29  ;;  %s1450_s28 = scalar_lea.hbm %s1498_s5, %s954_s10 }
 0x155   : > { %s808_s19 = sshll.u32 %s247_s18, 4  ;;  %s792_s13 = scalar_lea.sflag [#allocation3], %s1412_s29  ;;  %s1452_s19 = int_to_ptr.vmem [resolvable:$true] %s808_s19 }
 0x156   : > { %s1147_s14 = scalar_lea.vmem %s1452_s19, 16  ;;  %s1218_s25 = smov [#allocation2]  }
 0x157   : > { %p1148_p1 = scmp.ne.s32.totalorder %s1452_s19, %s1147_s14  ;;  %s1151_s15 = sshll.u32 %s1218_s25, 4  ;;  %s1152_s15 = int_to_ptr.vmem [resolvable:$false] %s1151_s15 }
 0x158   : > { %s1153_s9 = scalar_lea.vmem %s1152_s15, 32  ;;  %p1154_p4 = scmp.lt.s32.totalorder %s1452_s19, %s1152_s15 }
 0x159   : > { %p1149_p2 = pnand %p1148_p1, %p1292_p5  ;;  %p1155_p7 = scmp.lt.s32.totalorder %s1153_s9, %s1147_s14 }
 0x15b   : > { %p1150_p3 = pneg %p1149_p2  ;;  %p1156_p8 = por %p1155_p7, %p1154_p4 }
 0x15d   : > { %p1157_p9 = pnand %p1156_p8, %p1150_p3 }
 0x219   : > { %v784_v39 = vpop.f32.mrb[0].mxu1 }
 0x21a   : > { %v785_v40 = vadd.f32 %v784_v39, %v701_v38  ;;  %v1043_v41 = vpop.f32.mrb[1].mxu1 }
 0x21b   : > { %v787_v42 = vpop.f32.mrb[2].mxu1 }
 0x21c   : > { %790 = vst [vmem:[%s247_s18] sm:$0x1] %v785_v40  ;;  %v1044_v43 = vpop.f32.mrb[3].mxu1 }
 0x21d   : > { %1160 = shalt.err (!%p1157_p9)
}
 0x21e   : > { %s1161_s29 = scalar_lea.hbm %s1450_s28, 16  ;;  %s1165_s12 = scalar_lea.hbm %s1498_s5, 32 }
 0x21f   : > { %p1162_p10 = scmp.ne.s32.totalorder %s1450_s28, %s1161_s29  ;;  %p1166_p13 = scmp.lt.u32.totalorder %s1450_s28, %s1498_s5 }
 0x220   : > { %p1167_p0 = scmp.lt.u32.totalorder %s1165_s12, %s1161_s29  ;;  %p1169_p2 = scmp.lt.u32.totalorder %s1161_s29, %s1450_s28 }
 0x221   : > { %p1163_p11 = pnand %p1162_p10, %p1292_p5 }
 0x222   : > { %p1168_p1 = por %p1167_p0, %p1166_p13 }
 0x223   : > { %p1164_p12 = pneg %p1163_p11 }
 0x224   : > { %p1170_p3 = por %p1169_p2, %p1168_p1 }
 0x226   : > { %p1171_p4 = pnand %p1170_p3, %p1164_p12 }
 0x228   : > { %1174 = shalt.err (!%p1171_p4)
}
 0x229   : > { %1046 = dma.vmem_to_hbm [thread:$0]  (%p1292_p5), %s1452_s19, 16, %s1450_s28, %s792_s13  }
 0x22a PF: > { %p1057_p7 = scmp.ge.s32.totalorder %s1213_s24, 2  ;;  %s833_s18 = sand.u32 1, %s1201_s21  }
 0x22b   : > { %s834_s20 = scalar_lea.sflag [#allocation3], %s833_s18 }
 0x22c   : > { %p1051_p8 = pnand %p1057_p7, %p1296_p6 }
 0x22e   : > { %1192 = dma.done.wait (!%p1051_p8), %s834_s20, 16  }
 0x22f   : > { %1194 = vsyncadd (!%p1051_p8), %s834_s20, 4294967280  ;;  %s842_s26 = scalar_lea.sflag [#allocation5], %s833_s18 }
 0x230   : > { %1196 = dma.done.wait (!%p1051_p8), %s842_s26, 16  }
 0x231   : > { %1198 = vsyncadd (!%p1051_p8), %s842_s26, 4294967280  ;;  %p20_p5 = scmp.ge.s32.totalorder %s1279_s27, 4   ;;  %s1502_s21 = smov %s1205_s22 }
 0x232   : > { %s1503_s22 = smov %s1209_s23  ;;  %s1504_s23 = smov %s1290_s30 }
 0x233   : > { %s1505_s24 = smov %s1279_s27  ;;  %22 = sbr.rel (!%p20_p5) target bundleno = 5 (0x5), region = 92 }
 0x23a   :  { %846 = vsyncpa [#allocation3], 1 }
 0x23b   :  { %848 = vsyncpa [#allocation3 + $0x1], 1 }
 0x23c   :  { %849 = vsyncpa [#allocation5], 1 }
 0x23d   :  { %851 = vsyncpa [#allocation5 + $0x1], 1 }

</bundles_post_ra>
